<compile_context>
chip_gen: v5e
topology: v5e:2x2
jax: 0.10.0
libtpu: 0.0.40
codegen_flags: <defaults>
</compile_context>

<pallas_src>
import jax
import jax.numpy as jnp
from jax.experimental import pallas as pl
from jax.experimental.pallas import tpu as pltpu


# ~4 MiB blocks: big enough to amortize the ~0.35 us/step overhead and reach
# near HBM roofline; small enough that double-buffered in+out (4x block bytes
# = ~16 MiB) stays inside the default scoped VMEM limit on v5e/v6e/v7x.
_TARGET_BLOCK_BYTES = 4 * 1024 * 1024
_MAX_LANES = 8192  # lane-dim cap (multiple of 128)


def _copy_kernel(x_ref, o_ref):
    # Pure DMA-through copy: no in-kernel reshape, no VPU work (v5e-friendly).
    o_ref[...] = x_ref[...]


def _choose_2d_view(n, itemsize):
    """Pick (rows, lanes, row_tile) so a flat array of n elements is viewed as
    (rows, lanes) with `lanes` a multiple of 128 (lane-dense, unmasked stores)
    and tiled into (row_tile, lanes) blocks of roughly _TARGET_BLOCK_BYTES.
    row_tile always divides rows exactly (no partial blocks)."""
    if n % 128 != 0:
        # Degenerate small/odd sizes: one full-extent block (still correct;
        # the full-array block shape is exempt from the (8,128) rule).
        return 1, n, 1

    # Largest multiple-of-128 divisor of n that is <= _MAX_LANES.
    lanes = 128
    for cand in range(_MAX_LANES, 127, -128):
        if n % cand == 0:
            lanes = cand
            break
    rows = n // lanes

    max_rows_by_bytes = max(1, _TARGET_BLOCK_BYTES // (lanes * itemsize))
    if rows <= max_rows_by_bytes:
        row_tile = rows
    else:
        # Largest divisor of rows that is a multiple of 8 and fits the budget.
        row_tile = rows
        start = (max_rows_by_bytes // 8) * 8
        for cand in range(start, 7, -8):
            if rows % cand == 0:
                row_tile = cand
                break
    return rows, lanes, row_tile


def _pallas_identity_copy(flat):
    """flat: 1-D array. Returns a freshly materialized copy via a lane-dense,
    large-tile Pallas copy kernel (pure HBM->VMEM->HBM streaming)."""
    n = flat.shape[0]
    rows, lanes, row_tile = _choose_2d_view(n, flat.dtype.itemsize)
    x2d = flat.reshape(rows, lanes)  # metadata-only view change in HBM

    out2d = pl.pallas_call(
        _copy_kernel,
        out_shape=jax.ShapeDtypeStruct((rows, lanes), flat.dtype),
        grid=(rows // row_tile,),
        in_specs=[pl.BlockSpec((row_tile, lanes), lambda i: (i, 0))],
        out_specs=pl.BlockSpec((row_tile, lanes), lambda i: (i, 0)),
        compiler_params=pltpu.CompilerParams(
            dimension_semantics=("parallel",),  # shards chunks across v7x's 2 TCs
        ),
    )(x2d)
    return out2d.reshape(n)  # metadata-only


def flatten_custom(x, *, force_copy_kernel=False):
    """JAX equivalent of Flatten_custom.forward.

    Default path: pure metadata reshape (zero data movement) — the flatten of a
    row-major array never needs a kernel.
    force_copy_kernel=True: additionally materialize the result through the
    lane-dense Pallas copy kernel (e.g. as a stand-in for fusing downstream
    work into the kernel body).
    """
    if x.ndim == 4:
        out_shape = (x.shape[0], x.shape[1] * x.shape[2] * x.shape[3])
    else:
        # torch.flatten(x, 0, -1): flatten everything, any rank.
        out_shape = (x.size,)

    if not force_copy_kernel:
        return x.reshape(out_shape)  # zero-cost, the recommended path

    flat = x.reshape(-1)                 # metadata-only collapse in HBM
    y = _pallas_identity_copy(flat)      # Pallas streaming copy
    return y.reshape(out_shape)          # metadata-only


if __name__ == "__main__":
    key = jax.random.PRNGKey(0)
    k4, k3 = jax.random.split(key)

    # 4-D (batched) case: (B, C, H, W) = (2, 4, 16, 16) -> (2, 1024)
    x4 = jax.random.normal(k4, (2, 4, 16, 16), dtype=jnp.float32)
    ref4 = x4.reshape(2, -1)

    # Zero-copy default path.
    y4_fast = jax.block_until_ready(flatten_custom(x4))
    assert y4_fast.shape == (2, 4 * 16 * 16), y4_fast.shape
    assert jnp.array_equal(y4_fast, ref4), "4D flatten (metadata path) mismatch"

    # Pallas copy-kernel path (lane-dense, large-tile identity copy).
    y4 = jax.block_until_ready(flatten_custom(x4, force_copy_kernel=True))
    assert y4.shape == (2, 4 * 16 * 16), y4.shape
    assert y4.dtype == x4.dtype
    assert jnp.array_equal(y4, ref4), "4D flatten (kernel path) mismatch"

    # 3-D (unbatched) case: (C, H, W) = (4, 16, 16) -> (1024,)
    x3 = jax.random.normal(k3, (4, 16, 16), dtype=jnp.float32)
    ref3 = x3.reshape(-1)

    y3_fast = jax.block_until_ready(flatten_custom(x3))
    assert y3_fast.shape == (4 * 16 * 16,), y3_fast.shape
    assert jnp.array_equal(y3_fast, ref3), "3D flatten (metadata path) mismatch"

    y3 = jax.block_until_ready(flatten_custom(x3, force_copy_kernel=True))
    assert y3.shape == (4 * 16 * 16,), y3.shape
    assert jnp.array_equal(y3, ref3), "3D flatten (kernel path) mismatch"

    print("KERNEL_OK")
</pallas_src>

<mosaic_0001>
module attributes {stable_mosaic.version = 11 : i64} {
  func.func @_copy_kernel(%arg0: i32, %arg1: memref<1x2048xf32, #tpu.memory_space<vmem>>, %arg2: memref<1x2048xf32, #tpu.memory_space<vmem>>) attributes {dimension_semantics = [#tpu.dimension_semantics<parallel>], iteration_bounds = array<i64: 1>, scalar_prefetch = 0 : i64, scratch_operands = 0 : i64, tpu.core_type = #tpu.core_type<tc>, window_params = [{transform_indices = @transform_0, window_bounds = array<i64: 1, 2048>}, {transform_indices = @transform_1, window_bounds = array<i64: 1, 2048>}]} {
    %c0 = arith.constant 0 : index
    %c0_0 = arith.constant 0 : index
    %0 = vector.load %arg1[%c0, %c0_0] : memref<1x2048xf32, #tpu.memory_space<vmem>>, vector<1x2048xf32>
    %c0_1 = arith.constant 0 : index
    %c0_2 = arith.constant 0 : index
    %1 = vector.load %arg2[%c0_1, %c0_2] : memref<1x2048xf32, #tpu.memory_space<vmem>>, vector<1x2048xf32>
    tpu.vector_store %arg2[%c0_1, %c0_2], %0 {strides = array<i32>} : memref<1x2048xf32, #tpu.memory_space<vmem>>, vector<1x2048xf32>,
    return
  }
  func.func @transform_0(%arg0: i32) -> (i32, i32) {
    %c0_i32 = arith.constant 0 : i32
    %c0_i32_0 = arith.constant 0 : i32
    return %arg0, %c0_i32 : i32, i32
  }
  func.func @transform_1(%arg0: i32) -> (i32, i32) {
    %c0_i32 = arith.constant 0 : i32
    %c0_i32_0 = arith.constant 0 : i32
    return %arg0, %c0_i32 : i32, i32
  }
}

</mosaic_0001>

<bundles_post_ra>
// kernel: tpu_custom_call.1
= control target key start
LH: loop header
LB: loop body
LE: loop exit
PB: predicated region body
PF: predicated region fallthrough
CT: control target
= control target key end

     0   :  { %6 = vsyncpa [#allocation3], 0  ;;  %s116_s0 = inlined_call_operand.hbm [shape: f32[1,2048], index: 0, kind: input, shape index: {}]   ;;  %s117_s1 = inlined_call_operand.hbm [shape: f32[1,2048], index: 1, kind: output, shape index: {}]  }
   0x1   :  { %7 = vsyncpa [#allocation4], 0  ;;  %s13_s8 = sshll.u32 %s116_s0, 4  ;;  %s98_s9 = smov [#allocation2]   ;;  %s14_s8 = int_to_ptr.hbm [resolvable:$true] %s13_s8 }
   0x2   :  { %s15_s10 = sshll.u32 %s98_s9, 4  ;;  %s16_s10 = int_to_ptr.vmem [resolvable:$true] %s15_s10 }
   0x3   :  { %18 = dma.hbm_to_vmem [thread:$0]  %s14_s8, 256, %s16_s10, [#allocation3]  }
   0x4   :  { %94 = dma.done.wait [#allocation3], 256  }
   0x5   :  { %95 = vsyncadd [#allocation3], 4294967040  ;;  %s99_s11 = smov [#allocation5]   ;;  %s34_s15 = sshll.u32 %s117_s1, 4  ;;  %v23_v0 = vld [vmem:[#allocation2] sm:$0xff]  ;;  %v24_v1 = vld [vmem:[#allocation2 + $0x8] sm:$0xff]  ;;  %s35_s15 = int_to_ptr.hbm [resolvable:$true] %s34_s15 }
   0x6   :  { %s32_s12 = sshll.u32 %s99_s11, 4  ;;  %25 = vst [vmem:[#allocation5] sm:$0xff] %v23_v0  ;;  %s33_s12 = int_to_ptr.vmem [resolvable:$true] %s32_s12 }
   0x7   :  { %26 = vst [vmem:[#allocation5 + $0x8] sm:$0xff] %v24_v1 }
   0x8   :  { %37 = dma.vmem_to_hbm [thread:$0]  %s33_s12, 256, %s35_s15, [#allocation4]  }
   0x9   :  { %96 = dma.done.wait [#allocation4], 256  }
   0xa   :  { %97 = vsyncadd [#allocation4], 4294967040 }
   0xb   :  { %42 = vsyncpa [#allocation3], 1 }
   0xc   :  { %43 = vsyncpa [#allocation4], 1 }

</bundles_post_ra>
